<compile_context>
chip_gen: v6e
topology: v6e:2x2x1
jax: 0.10.0
libtpu: 0.0.40
codegen_flags: <defaults>
</compile_context>

<pallas_src>
import functools

import jax
import jax.numpy as jnp
import numpy as np
from jax import lax
from jax.experimental import pallas as pl
from jax.experimental.pallas import tpu as pltpu


_LANE = 512                              # lane-dense last dim (4 * 128)
_TARGET_BLOCK_BYTES = 4 * 1024 * 1024    # per-input block footprint


def _round_up(v, m):
    return ((v + m - 1) // m) * m


# ---------------------------------------------------------------------------
# Kernel
# ---------------------------------------------------------------------------
def _charbonnier_sum_kernel(x_ref, y_ref, o_ref, acc_ref, *,
                            eps2, bm, lane, inner, nblocks, rows, has_phantom):
    """Accumulate sum(sqrt((x-y)^2 + eps^2)).

    Grid = (nchunks [parallel], inner [arbitrary, reduction]).  Each chunk
    writes its own partial sum into o_ref (SMEM scalar block).
    """
    c = pl.program_id(0)
    i = pl.program_id(1)
    blk = c * inner + i                       # global (unclamped) block index

    @pl.when(i == 0)
    def _():
        acc_ref[...] = jnp.zeros_like(acc_ref)

    steps = bm // 8
    unroll = min(8, steps)

    def block_partial(masked):
        # Fold the (bm, lane) block into an (8, lane) partial with pure VPU
        # adds, one 8-row slice at a time (no full-block temp, no XLU).
        if masked:
            row_iota = lax.broadcasted_iota(jnp.int32, (8, lane), 0)
            valid = rows - blk * bm           # valid rows in this block

        def body(r, part):
            start = pl.multiple_of(r * 8, 8)
            xs = x_ref[pl.ds(start, 8), :].astype(jnp.float32)
            ys = y_ref[pl.ds(start, 8), :].astype(jnp.float32)
            d = xs - ys
            v = jnp.sqrt(d * d + jnp.float32(eps2))       # EUP
            if masked:
                v = jnp.where(row_iota + start < valid, v, jnp.float32(0.0))
            return part + v

        return lax.fori_loop(0, steps, body,
                             jnp.zeros((8, lane), jnp.float32),
                             unroll=unroll)

    ragged = (rows % bm) != 0                 # static (trace-time) bool
    full_blocks = nblocks - 1 if ragged else nblocks

    if not ragged and not has_phantom:
        # Fast path: every grid step is a full, valid block (no mask at all).
        acc_ref[...] += block_partial(masked=False)
    else:
        if full_blocks > 0:
            @pl.when(blk < full_blocks)
            def _():
                acc_ref[...] += block_partial(masked=False)
        if ragged:
            @pl.when(blk == nblocks - 1)
            def _():
                acc_ref[...] += block_partial(masked=True)
        # blk >= nblocks (phantom steps) contribute nothing.

    # One cross-lane/sublane reduce + scalar SMEM store per chunk, last step.
    @pl.when(i == pl.num_programs(1) - 1)
    def _():
        o_ref[0, 0] = jnp.sum(acc_ref[...])


# ---------------------------------------------------------------------------
# pallas_call wrapper
# ---------------------------------------------------------------------------
def _charbonnier_total(x, y, eps):
    """Returns sum(sqrt((x-y)^2 + eps^2)) over all elements, as f32."""
    numel = int(np.prod(x.shape))
    eps2 = float(eps) * float(eps)
    lane = _LANE

    rows = numel // lane                      # rows of the lane-dense slab
    main = rows * lane
    tail = numel - main                       # < 512 leftover elements

    x_flat = jnp.reshape(x, (-1,))
    y_flat = jnp.reshape(y, (-1,))

    total = jnp.float32(0.0)

    if rows > 0:
        if tail:
            # Ragged tail: slice off the (tiny) remainder; the main slab is a
            # contiguous prefix.  In the common numel % 512 == 0 case this
            # branch is skipped and the reshape is free (no extra HBM copy).
            x_main = lax.slice(x_flat, (0,), (main,))
            y_main = lax.slice(y_flat, (0,), (main,))
        else:
            x_main, y_main = x_flat, y_flat
        x2d = jnp.reshape(x_main, (rows, lane))
        y2d = jnp.reshape(y_main, (rows, lane))

        itemsize = jnp.dtype(x.dtype).itemsize
        sub = {4: 8, 2: 16, 1: 32}.get(itemsize, 8)   # sublane tile per dtype

        bm_target = max(sub,
                        (_TARGET_BLOCK_BYTES // (lane * itemsize)) // sub * sub)
        bm = min(bm_target, _round_up(rows, sub))     # multiple of `sub`
        nblocks = -(-rows // bm)
        # Leading "parallel" axis: 2-way split for v7x megacore; on single-TC
        # chips it only adds one extra accumulator finalize (negligible).
        nchunks = 2 if nblocks >= 2 else 1
        inner = -(-nblocks // nchunks)
        has_phantom = nchunks * inner > nblocks

        if has_phantom:
            # Clamp the one phantom step to the last valid block so its DMA
            # stays in bounds; the kernel skips its contribution.
            def idx_map(c, i):
                return (jnp.minimum(c * inner + i, nblocks - 1), 0)
        else:
            def idx_map(c, i):
                return (c * inner + i, 0)

        kernel = functools.partial(
            _charbonnier_sum_kernel, eps2=eps2, bm=bm, lane=lane,
            inner=inner, nblocks=nblocks, rows=rows, has_phantom=has_phantom)

        in_spec = pl.BlockSpec((bm, lane), idx_map)
        out_spec = pl.BlockSpec((1, 1), lambda c, i: (c, 0),
                                memory_space=pltpu.SMEM)

        cost = pl.CostEstimate(flops=5 * main,
                               transcendentals=main,
                               bytes_accessed=2 * main * itemsize + 8 * nchunks)

        partials = pl.pallas_call(
            kernel,
            out_shape=jax.ShapeDtypeStruct((nchunks, 1), jnp.float32),
            grid_spec=pltpu.PrefetchScalarGridSpec(
                num_scalar_prefetch=0,
                grid=(nchunks, inner),
                in_specs=[in_spec, in_spec],
                out_specs=out_spec,
                scratch_shapes=[pltpu.VMEM((8, lane), jnp.float32)],
            ),
            compiler_params=pltpu.CompilerParams(
                dimension_semantics=("parallel", "arbitrary"),
                vmem_limit_bytes=48 * 1024 * 1024,
            ),
            cost_estimate=cost,
        )(x2d, y2d)

        total = total + jnp.sum(partials)

    if tail:
        # < 512 leftover elements: trivial in plain JAX.
        xt = lax.slice(x_flat, (main,), (numel,)).astype(jnp.float32)
        yt = lax.slice(y_flat, (main,), (numel,)).astype(jnp.float32)
        d = xt - yt
        total = total + jnp.sum(jnp.sqrt(d * d + jnp.float32(eps2)))

    return total


# ---------------------------------------------------------------------------
# Module equivalent
# ---------------------------------------------------------------------------
class CharbonnierLossPallas:
    """Pallas equivalent of the PyTorch CharbonnierLoss module (forward only)."""

    def __init__(self, eps=1e-3):
        self.eps = float(eps)
        self._loss = jax.jit(self._loss_impl)

    def _loss_impl(self, x, y):
        numel = int(np.prod(x.shape))
        return _charbonnier_total(x, y, self.eps) / jnp.float32(numel)

    def __call__(self, x, y):
        assert x.shape == y.shape
        return self._loss(x, y)


# ---------------------------------------------------------------------------
# Reference (plain JAX) for sanity checking
# ---------------------------------------------------------------------------
def _charbonnier_ref(x, y, eps=1e-3):
    diff = x.astype(jnp.float32) - y.astype(jnp.float32)
    return jnp.mean(jnp.sqrt(diff * diff + jnp.float32(eps * eps)))


# ---------------------------------------------------------------------------
if __name__ == "__main__":
    key = jax.random.PRNGKey(0)
    keys = jax.random.split(key, 8)

    loss_mod = CharbonnierLossPallas(eps=1e-3)
    ok = True

    # 1) Small NCHW batch (module's typical use): single masked block, no pad.
    x = jax.random.normal(keys[0], (2, 4, 16, 16), dtype=jnp.float32)
    y = jax.random.normal(keys[1], (2, 4, 16, 16), dtype=jnp.float32)
    out = jax.block_until_ready(loss_mod(x, y))
    ref = _charbonnier_ref(x, y, 1e-3)
    ok &= bool(np.allclose(np.asarray(out), np.asarray(ref),
                           rtol=1e-5, atol=1e-6))

    # 2) Ragged numel (not a multiple of 512): kernel main slab + JAX tail.
    x2 = jax.random.normal(keys[2], (2, 3, 17, 19), dtype=jnp.float32)
    y2 = jax.random.normal(keys[3], (2, 3, 17, 19), dtype=jnp.float32)
    out2 = jax.block_until_ready(loss_mod(x2, y2))
    ref2 = _charbonnier_ref(x2, y2, 1e-3)
    ok &= bool(np.allclose(np.asarray(out2), np.asarray(ref2),
                           rtol=1e-5, atol=1e-6))

    # 3) Larger, block-aligned input: pure fast path, 2-chunk parallel split.
    x3 = jax.random.normal(keys[4], (8, 16, 128, 128), dtype=jnp.float32)
    y3 = jax.random.normal(keys[5], (8, 16, 128, 128), dtype=jnp.float32)
    out3 = jax.block_until_ready(loss_mod(x3, y3))
    ref3 = _charbonnier_ref(x3, y3, 1e-3)
    ok &= bool(np.allclose(np.asarray(out3), np.asarray(ref3),
                           rtol=1e-4, atol=1e-6))

    # 4) Odd block count: exercises ragged final block + clamped phantom step.
    x4 = jax.random.normal(keys[6], (8, 16, 160, 128), dtype=jnp.float32)
    y4 = jax.random.normal(keys[7], (8, 16, 160, 128), dtype=jnp.float32)
    out4 = jax.block_until_ready(loss_mod(x4, y4))
    ref4 = _charbonnier_ref(x4, y4, 1e-3)
    ok &= bool(np.allclose(np.asarray(out4), np.asarray(ref4),
                           rtol=1e-4, atol=1e-6))

    if ok:
        print("KERNEL_OK")
    else:
        raise SystemExit("mismatch vs reference")
</pallas_src>

<mosaic_0001>
module attributes {stable_mosaic.version = 11 : i64} {
  func.func @_charbonnier_sum_kernel(%arg0: i32, %arg1: i32, %arg2: memref<8x512xf32, #tpu.memory_space<vmem>>, %arg3: memref<8x512xf32, #tpu.memory_space<vmem>>, %arg4: memref<1x1xf32, #tpu.memory_space<smem>>, %arg5: memref<8x512xf32, #tpu.memory_space<vmem>>) attributes {dimension_semantics = [#tpu.dimension_semantics<parallel>, #tpu.dimension_semantics<arbitrary>], iteration_bounds = array<i64: 1, 1>, scalar_prefetch = 0 : i64, scratch_operands = 1 : i64, tpu.core_type = #tpu.core_type<tc>, window_params = [{transform_indices = @transform_0, window_bounds = array<i64: 8, 512>}, {transform_indices = @transform_1, window_bounds = array<i64: 8, 512>}, {transform_indices = @transform_2, window_bounds = array<i64: 1, 1>}]} {
    %c1_i32 = arith.constant 1 : i32
    %0 = arith.muli %arg0, %c1_i32 : i32
    %1 = arith.addi %0, %arg1 : i32
    %c0_i32 = arith.constant 0 : i32
    %2 = arith.cmpi eq, %arg1, %c0_i32 : i32
    %3 = arith.extui %2 : i1 to i32
    %c0_i32_0 = arith.constant 0 : i32
    %4 = arith.cmpi ne, %3, %c0_i32_0 : i32
    scf.if %4 {
      %cst = arith.constant 0.000000e+00 : f32
      %11 = vector.broadcast %cst : f32 to vector<8x512xf32>
      %c0 = arith.constant 0 : index
      %c0_5 = arith.constant 0 : index
      %12 = vector.load %arg5[%c0, %c0_5] : memref<8x512xf32, #tpu.memory_space<vmem>>, vector<8x512xf32>
      tpu.vector_store %arg5[%c0, %c0_5], %11 {strides = array<i32>} : memref<8x512xf32, #tpu.memory_space<vmem>>, vector<8x512xf32>,
    } else {
    }
    %c0_i32_1 = arith.constant 0 : i32
    %5 = arith.cmpi eq, %1, %c0_i32_1 : i32
    %6 = arith.extui %5 : i1 to i32
    %c0_i32_2 = arith.constant 0 : i32
    %7 = arith.cmpi ne, %6, %c0_i32_2 : i32
    scf.if %7 {
      %c0 = arith.constant 0 : index
      %c0_5 = arith.constant 0 : index
      %11 = vector.load %arg5[%c0, %c0_5] : memref<8x512xf32, #tpu.memory_space<vmem>>, vector<8x512xf32>
      %12 = tpu.iota {dimensions = array<i32: 0>} : vector<8x512xi32>
      %c8_i32 = arith.constant 8 : i32
      %13 = arith.muli %1, %c8_i32 : i32
      %c4_i32 = arith.constant 4 : i32
      %14 = arith.subi %c4_i32, %13 : i32
      %cst = arith.constant 0.000000e+00 : f32
      %15 = vector.broadcast %cst : f32 to vector<8x512xf32>
      %c0_i32_6 = arith.constant 0 : i32
      %c8_i32_7 = arith.constant 8 : i32
      %16 = arith.muli %c0_i32_6, %c8_i32_7 : i32
      %17 = tpu.assume_multiple %16, 8 : i32
      %18 = arith.index_cast %17 : i32 to index
      %c0_8 = arith.constant 0 : index
      %19 = vector.load %arg2[%18, %c0_8] : memref<8x512xf32, #tpu.memory_space<vmem>>, vector<8x512xf32>
      %20 = arith.index_cast %17 : i32 to index
      %c0_9 = arith.constant 0 : index
      %21 = vector.load %arg3[%20, %c0_9] : memref<8x512xf32, #tpu.memory_space<vmem>>, vector<8x512xf32>
      %22 = arith.subf %19, %21 : vector<8x512xf32>
      %23 = arith.mulf %22, %22 : vector<8x512xf32>
      %cst_10 = arith.constant 9.99999997E-7 : f32
      %24 = vector.broadcast %cst_10 : f32 to vector<8x512xf32>
      %25 = arith.addf %23, %24 : vector<8x512xf32>
      %26 = math.sqrt %25 : vector<8x512xf32>
      %27 = vector.broadcast %17 : i32 to vector<8x512xi32>
      %28 = arith.addi %12, %27 : vector<8x512xi32>
      %29 = vector.broadcast %14 : i32 to vector<8x512xi32>
      %30 = arith.cmpi slt, %28, %29 : vector<8x512xi32>
      %cst_11 = arith.constant 0.000000e+00 : f32
      %31 = vector.broadcast %cst_11 : f32 to vector<8x512xf32>
      %32 = arith.select %30, %26, %31 : vector<8x512xi1>, vector<8x512xf32>
      %33 = arith.addf %15, %32 : vector<8x512xf32>
      %c1_i32_12 = arith.constant 1 : i32
      %34 = arith.addf %11, %33 : vector<8x512xf32>
      %c0_13 = arith.constant 0 : index
      %c0_14 = arith.constant 0 : index
      %35 = vector.load %arg5[%c0_13, %c0_14] : memref<8x512xf32, #tpu.memory_space<vmem>>, vector<8x512xf32>
      tpu.vector_store %arg5[%c0_13, %c0_14], %34 {strides = array<i32>} : memref<8x512xf32, #tpu.memory_space<vmem>>, vector<8x512xf32>,
    } else {
    }
    %c0_i32_3 = arith.constant 0 : i32
    %8 = arith.cmpi eq, %arg1, %c0_i32_3 : i32
    %9 = arith.extui %8 : i1 to i32
    %c0_i32_4 = arith.constant 0 : i32
    %10 = arith.cmpi ne, %9, %c0_i32_4 : i32
    scf.if %10 {
      %c0 = arith.constant 0 : index
      %c0_5 = arith.constant 0 : index
      %11 = vector.load %arg5[%c0, %c0_5] : memref<8x512xf32, #tpu.memory_space<vmem>>, vector<8x512xf32>
      %12 = vector.shape_cast %11 : vector<8x512xf32> to vector<1x8x512xf32>
      %cst = arith.constant dense<0.000000e+00> : vector<1xf32>
      %13 = vector.multi_reduction <add>, %12, %cst [1, 2] : vector<1x8x512xf32> to vector<1xf32>
      %14 = vector.shape_cast %13 : vector<1xf32> to vector<1x1x1xf32>
      %15 = vector.extract %14[0, 0, 0] : f32 from vector<1x1x1xf32>
      %c0_6 = arith.constant 0 : index
      %c0_7 = arith.constant 0 : index
      %16 = memref.load %arg4[%c0_6, %c0_7] : memref<1x1xf32, #tpu.memory_space<smem>>
      memref.store %15, %arg4[%c0_6, %c0_7] : memref<1x1xf32, #tpu.memory_space<smem>>
    } else {
    }
    return
  }
  func.func @transform_0(%arg0: i32, %arg1: i32) -> (i32, i32) {
    %c1_i32 = arith.constant 1 : i32
    %0 = arith.muli %arg0, %c1_i32 : i32
    %1 = arith.addi %0, %arg1 : i32
    %c0_i32 = arith.constant 0 : i32
    %c0_i32_0 = arith.constant 0 : i32
    return %1, %c0_i32 : i32, i32
  }
  func.func @transform_1(%arg0: i32, %arg1: i32) -> (i32, i32) {
    %c1_i32 = arith.constant 1 : i32
    %0 = arith.muli %arg0, %c1_i32 : i32
    %1 = arith.addi %0, %arg1 : i32
    %c0_i32 = arith.constant 0 : i32
    %c0_i32_0 = arith.constant 0 : i32
    return %1, %c0_i32 : i32, i32
  }
  func.func @transform_2(%arg0: i32, %arg1: i32) -> (i32, i32) {
    %c0_i32 = arith.constant 0 : i32
    %c0_i32_0 = arith.constant 0 : i32
    return %arg0, %c0_i32 : i32, i32
  }
}

</mosaic_0001>

<bundles_post_ra>
// kernel: _loss_impl.1
= control target key start
LH: loop header
LB: loop body
LE: loop exit
PB: predicated region body
PF: predicated region fallthrough
CT: control target
= control target key end

     0   :  { %s310_s0 = inlined_call_operand.vmem [shape: f32[4,512], index: 0, kind: input, shape index: {}]   ;;  %s311_s1 = inlined_call_operand.vmem [shape: f32[4,512], index: 1, kind: input, shape index: {}]   ;;  %s312_s2 = inlined_call_operand.hbm [shape: f32[1,1], index: 2, kind: output, shape index: {}]  }
   0x1   :  { %v116_v0 = vld [vmem:[%s310_s0] sm:$0xff]  ;;  %v117_v1 = vld [vmem:[%s310_s0 + $0x8] sm:$0xff]  ;;  %v118_v2 = vld [vmem:[%s310_s0 + $0x10] sm:$0xff] }
   0x2   :  { %v119_v3 = vld [vmem:[%s310_s0 + $0x18] sm:$0xff]  ;;  %v122_v4 = vld [vmem:[%s311_s1] sm:$0xff]  ;;  %v123_v5 = vld [vmem:[%s311_s1 + $0x8] sm:$0xff] }
   0x3   :  { %v124_v6 = vld [vmem:[%s311_s1 + $0x10] sm:$0xff]  ;;  %v125_v7 = vld [vmem:[%s311_s1 + $0x18] sm:$0xff]  ;;  %v126_v8 = vsub.f32 %v116_v0, %v122_v4  ;;  %v127_v9 = vsub.f32 %v117_v1, %v123_v5 }
   0x4   :  { %7 = vsyncpa [#allocation4], 0  ;;  %v128_v10 = vsub.f32 %v118_v2, %v124_v6  ;;  %v129_v11 = vsub.f32 %v119_v3, %v125_v7  ;;  %v109_v20 = vlaneseq  ;;  %s265_s1 = smov [#allocation3]  }
   0x5   :  { %v130_v12 = vmul.f32 %v126_v8, %v126_v8  ;;  %v131_v13 = vmul.f32 %v127_v9, %v127_v9 }
   0x6   :  { %v132_v14 = vmul.f32 %v128_v10, %v128_v10  ;;  %v133_v15 = vmul.f32 %v129_v11, %v129_v11  ;;  %v110_v22 = vshrl.u32 %v109_v20, 7 }
   0x7   :  { %v134_v16 = vadd.f32 1e-06, %v130_v12  ;;  %v135_v17 = vadd.f32 1e-06, %v131_v13 }
   0x8   :  { %v136_v18 = vadd.f32 1e-06, %v132_v14  ;;  %v137_v19 = vadd.f32 1e-06, %v133_v15  ;;  %vm169_vm8 = vcmp.lt.s32.totalorder %v110_v22, 4 }
   0x9   :  { %247 = vrsqrt.f32 %v134_v16  ;;  %vm140_vm0 = vcmp.eq.f32.partialorder %v134_v16, inf  ;;  %vm142_vm1 = vcmp.eq.f32.partialorder %v134_v16, 0.0  ;;  %v143_v23 = vand.u32 2147483648, %v134_v16 }
   0xa   :  { %249 = vrsqrt.f32 %v135_v17  ;;  %vm147_vm2 = vcmp.eq.f32.partialorder %v135_v17, inf  ;;  %vm149_vm3 = vcmp.eq.f32.partialorder %v135_v17, 0.0  ;;  %v150_v26 = vand.u32 2147483648, %v135_v17 }
   0xb   :  { %251 = vrsqrt.f32 %v136_v18  ;;  %vm154_vm4 = vcmp.eq.f32.partialorder %v136_v18, inf  ;;  %vm156_vm5 = vcmp.eq.f32.partialorder %v136_v18, 0.0  ;;  %v157_v29 = vand.u32 2147483648, %v136_v18 }
   0xc   :  { %253 = vrsqrt.f32 %v137_v19  ;;  %vm161_vm6 = vcmp.eq.f32.partialorder %v137_v19, inf  ;;  %v164_v33 = vand.u32 2147483648, %v137_v19  ;;  %vm163_vm7 = vcmp.eq.f32.partialorder %v137_v19, 0.0 }
  0x16   :  { %v248_v21 = vpop.eup %247 }
  0x17   :  { %v250_v24 = vpop.eup %249  ;;  %v139_v25 = vmul.f32 %v248_v21, %v134_v16 }
  0x18   :  { %v252_v27 = vpop.eup %251  ;;  %v146_v28 = vmul.f32 %v250_v24, %v135_v17 }
  0x19   :  { %v254_v30 = vpop.eup %253  ;;  %v141_v31 = vsel %vm140_vm0, %v134_v16, %v139_v25  ;;  %v153_v32 = vmul.f32 %v252_v27, %v136_v18 }
  0x1a   :  { %v144_v34 = vsel %vm142_vm1, %v143_v23, %v141_v31  ;;  %v148_v35 = vsel %vm147_vm2, %v135_v17, %v146_v28  ;;  %v160_v36 = vmul.f32 %v254_v30, %v137_v19 }
  0x1b   :  { %v151_v37 = vsel %vm149_vm3, %v150_v26, %v148_v35  ;;  %v155_v38 = vsel %vm154_vm4, %v136_v18, %v153_v32 }
  0x1c   :  { %v158_v39 = vsel %vm156_vm5, %v157_v29, %v155_v38  ;;  %v162_v40 = vsel %vm161_vm6, %v137_v19, %v160_v36 }
  0x1d   :  { %v165_v41 = vsel %vm163_vm7, %v164_v33, %v162_v40  ;;  %v174_v42 = vcombine.low %v144_v34, %v158_v39  ;;  %v175_v43 = vcombine.high %v144_v34, %v158_v39 }
  0x1e   :  { %v176_v44 = vcombine.low %v151_v37, %v165_v41  ;;  %v177_v45 = vcombine.high %v151_v37, %v165_v41 }
  0x1f   :  { %v182_v46 = vsel %vm169_vm8, %v174_v42, 0.0  ;;  %v183_v47 = vsel %vm169_vm8, %v175_v43, 0.0 }
  0x20   :  { %v184_v48 = vsel %vm169_vm8, %v176_v44, 0.0  ;;  %v205_v49 = vadd.f32 %v183_v47, %v182_v46  ;;  %v185_v50 = vsel %vm169_vm8, %v177_v45, 0.0 }
  0x22   :  { %v206_v51 = vadd.f32 %v205_v49, %v184_v48 }
  0x24   :  { %v207_v52 = vadd.f32 %v206_v51, %v185_v50 }
  0x26   :  { %208 = vadd.xlane.f32.xlu0 %v207_v52 }
  0xaf   :  { %v209_v53 = vpop.xlane.xlu0 %208 }
  0xb0   :  { %v210_v54 = vrot.slane %v209_v53, 4 }
  0xb2   :  { %v211_v55 = vadd.f32 %v210_v54, %v209_v53 }
  0xb4   :  { %v212_v56 = vrot.slane %v211_v55, 2 }
  0xb6   :  { %v213_v57 = vadd.f32 %v212_v56, %v211_v55 }
  0xb8   :  { %v214_v58 = vrot.slane %v213_v57, 1 }
  0xba   :  { %v215_v59 = vadd.f32 %v214_v58, %v213_v57 }
  0xbc   :  { %244 = vpush %v215_v59 }
  0xed   :  { %s245_s0 = spop %244 }
  0xee   :  { %218 = sst [smem:[#allocation3]] %s245_s0 }
  0xef   :  { %226 = dma.smem_to_hbm %s265_s1, 16, %s312_s2, [#allocation4]  }
  0xf0   :  { %263 = dma.done.wait [#allocation4], 16  }
  0xf1   :  { %264 = vsyncadd [#allocation4], 4294967280 }
  0xf2   :  { %230 = sfence }
  0xf3   :  { %231 = vsyncpa [#allocation4], 1 }

</bundles_post_ra>
